<compile_context>
chip_gen: v7x
topology: tpu7x:2x2x1
jax: 0.10.0
libtpu: 0.0.40
codegen_flags: <defaults>
</compile_context>

<pallas_src>
import functools

import jax
import jax.numpy as jnp
from jax.experimental import pallas as pl
from jax.experimental.pallas import tpu as pltpu


_VMEM_TILE_BUDGET = 32 * 1024 * 1024   # conservative tile-sizing budget (all gens)
_VMEM_LIMIT_BYTES = 48 * 1024 * 1024   # < 64 MiB v7x physical, > scoped defaults


def _round_up(x, m):
    return ((x + m - 1) // m) * m


def _cdiv(a, b):
    return (a + b - 1) // b


def _generator_kernel(x_ref, w1_ref, b1_ref, w2_ref, b2_ref, o_ref, *, atype):
    # First linear (bf16 operands, f32 accumulate on the MXU) + bias + ReLU.
    h = jnp.dot(x_ref[...], w1_ref[...], preferred_element_type=jnp.float32)
    h = jnp.maximum(h + b1_ref[...], 0.0)          # (TB, H) + (1, H), f32

    # Second linear: cast activation to the weight dtype for the MXU,
    # accumulate in f32.
    y = jnp.dot(h.astype(w2_ref.dtype), w2_ref[...],
                preferred_element_type=jnp.float32)
    y = y + b2_ref[...]                            # (TB, image) + (1, image), f32

    if atype == "relu":
        y = jnp.maximum(y, 0.0)
    else:
        # sigmoid = 1 / (1 + exp(-y)); exp and approx-reciprocal both run on
        # the EUP slot, keeping the f32 epilogue off the VALU (v5e-friendly).
        y = pl.reciprocal(1.0 + jnp.exp(-y), approx=True)

    o_ref[...] = y.astype(o_ref.dtype)


def prepare_generator_params(w1, b1, w2, b2, compute_dtype=jnp.bfloat16):
    """One-time parameter casts, hoisted out of the per-call hot path."""
    return (jnp.asarray(w1, compute_dtype),
            jnp.asarray(b1, jnp.float32),
            jnp.asarray(w2, compute_dtype),
            jnp.asarray(b2, jnp.float32))


def generator_forward(x, w1, b1, w2, b2, *, atype="sigmoid",
                      batch_tile=2048, compute_dtype=jnp.bfloat16,
                      out_dtype=jnp.bfloat16):
    """Fused two-layer MLP generator forward pass.

    x:  (B, z_dim)
    w1: (z_dim, hidden), b1: (1, hidden)
    w2: (hidden, image), b2: (1, image)
    returns (B, image) in `out_dtype` (bf16 by default to halve HBM writeback).
    """
    if atype not in ("relu", "sigmoid"):
        raise ValueError(f"unsupported atype: {atype}")

    B, z_dim = x.shape
    hidden = w1.shape[1]
    image_size = w2.shape[1]

    # No-ops if params were already prepared via prepare_generator_params().
    w1_c = jnp.asarray(w1, compute_dtype)
    w2_c = jnp.asarray(w2, compute_dtype)
    b1_c = jnp.asarray(b1, jnp.float32).reshape(1, hidden)
    b2_c = jnp.asarray(b2, jnp.float32).reshape(1, image_size)
    x_c = jnp.asarray(x, compute_dtype)

    # ---- batch tiling ------------------------------------------------------
    bp0 = _round_up(B, 8)

    # VMEM-derived row cap: double-buffered x tile + out tile + resident weights.
    x_isz = jnp.dtype(compute_dtype).itemsize
    out_isz = jnp.dtype(out_dtype).itemsize
    per_row = 2 * (z_dim * x_isz + image_size * out_isz)
    weight_bytes = 2 * ((z_dim * hidden + hidden * image_size) * x_isz
                        + (hidden + image_size) * 4)
    avail = int(0.75 * _VMEM_TILE_BUDGET) - weight_bytes
    vmem_cap = max(8, (avail // per_row) // 8 * 8)

    # At least 2 tiles when the batch allows, so both v7x TensorCores get work;
    # tb derived from cdiv(bp0, n_tiles) to minimize batch padding.
    want_tiles = max(_cdiv(bp0, batch_tile), 2 if bp0 >= 16 else 1)
    tb = min(_round_up(_cdiv(bp0, want_tiles), 8), vmem_cap, bp0)
    n_tiles = _cdiv(bp0, tb)
    bp = n_tiles * tb

    if bp != B:
        x_c = jnp.pad(x_c, ((0, bp - B), (0, 0)))   # input-side pad only (cheap)

    kernel = functools.partial(_generator_kernel, atype=atype)

    out = pl.pallas_call(
        kernel,
        out_shape=jax.ShapeDtypeStruct((bp, image_size), out_dtype),
        grid=(n_tiles,),
        in_specs=[
            # x: tiled over batch only.
            pl.BlockSpec((tb, z_dim), lambda i: (i, 0)),
            # Weights / biases: full blocks, constant index_map -> VMEM-resident.
            pl.BlockSpec((z_dim, hidden), lambda i: (0, 0)),
            pl.BlockSpec((1, hidden), lambda i: (0, 0)),
            pl.BlockSpec((hidden, image_size), lambda i: (0, 0)),
            pl.BlockSpec((1, image_size), lambda i: (0, 0)),
        ],
        # Last block dim equals the full array dim (no lane padding, no
        # post-kernel column slice).
        out_specs=pl.BlockSpec((tb, image_size), lambda i: (i, 0)),
        compiler_params=pltpu.CompilerParams(
            dimension_semantics=("parallel",),     # v7x: split tiles across TCs
            vmem_limit_bytes=_VMEM_LIMIT_BYTES,
        ),
    )(x_c, w1_c, b1_c, w2_c, b2_c)

    if bp != B:
        out = out[:B]      # only when the batch itself needed padding
    return out


def _reference_forward(x, w1, b1, w2, b2, atype, compute_dtype=jnp.bfloat16):
    """JAX reference mirroring the kernel's bf16-operand / f32-accumulate math."""
    h = jnp.dot(x.astype(compute_dtype), w1.astype(compute_dtype),
                preferred_element_type=jnp.float32) + b1
    h = jnp.maximum(h, 0.0)
    y = jnp.dot(h.astype(compute_dtype), w2.astype(compute_dtype),
                preferred_element_type=jnp.float32) + b2
    if atype == "relu":
        return jnp.maximum(y, 0.0)
    return jax.nn.sigmoid(y)


if __name__ == "__main__":
    # Small, deterministic setup consistent with the module:
    # Generator(image_size=64, hidden_dim=32, z_dim=16, atype='sigmoid')
    batch = 8
    z_dim = 16
    hidden_dim = 32
    image_size = 64
    atype = "sigmoid"

    key = jax.random.PRNGKey(0)
    k_x, k_w1, k_b1, k_w2, k_b2 = jax.random.split(key, 5)

    x = jax.random.normal(k_x, (batch, z_dim), dtype=jnp.float32)

    # Deterministic parameter init (uniform, PyTorch-Linear-like scale).
    bound1 = 1.0 / (z_dim ** 0.5)
    w1 = jax.random.uniform(k_w1, (z_dim, hidden_dim), jnp.float32, -bound1, bound1)
    b1 = jax.random.uniform(k_b1, (1, hidden_dim), jnp.float32, -bound1, bound1)

    bound2 = 1.0 / (hidden_dim ** 0.5)
    w2 = jax.random.uniform(k_w2, (hidden_dim, image_size), jnp.float32, -bound2, bound2)
    b2 = jax.random.uniform(k_b2, (1, image_size), jnp.float32, -bound2, bound2)

    # One-time parameter prep (casts hoisted out of the hot path).
    w1_p, b1_p, w2_p, b2_p = prepare_generator_params(w1, b1, w2, b2)

    out = generator_forward(x, w1_p, b1_p, w2_p, b2_p, atype=atype)
    out = jax.block_until_ready(out)

    assert out.shape == (batch, image_size), out.shape
    assert out.dtype == jnp.bfloat16, out.dtype

    out_f32 = out.astype(jnp.float32)
    ref_bf16 = _reference_forward(x, w1, b1, w2, b2, atype)
    ref_f32 = jax.nn.sigmoid(jnp.maximum(x @ w1 + b1, 0.0) @ w2 + b2)

    # Tolerances account for bf16 output rounding + approx reciprocal.
    assert jnp.allclose(out_f32, ref_bf16, atol=1e-2, rtol=1e-2), \
        "mismatch vs bf16-mirrored reference"
    assert jnp.allclose(out_f32, ref_f32, atol=3e-2, rtol=3e-2), \
        "mismatch vs f32 reference"

    print("KERNEL_OK")
</pallas_src>

<mosaic_0001>
module attributes {stable_mosaic.version = 11 : i64} {
  func.func @_generator_kernel(%arg0: i32, %arg1: memref<8x16xbf16, #tpu.memory_space<vmem>>, %arg2: memref<16x32xbf16, #tpu.memory_space<vmem>>, %arg3: memref<1x32xf32, #tpu.memory_space<vmem>>, %arg4: memref<32x64xbf16, #tpu.memory_space<vmem>>, %arg5: memref<1x64xf32, #tpu.memory_space<vmem>>, %arg6: memref<8x64xbf16, #tpu.memory_space<vmem>>) attributes {dimension_semantics = [#tpu.dimension_semantics<parallel>], iteration_bounds = array<i64: 1>, scalar_prefetch = 0 : i64, scratch_operands = 0 : i64, tpu.core_type = #tpu.core_type<tc>, window_params = [{transform_indices = @transform_0, window_bounds = array<i64: 8, 16>}, {pipeline_mode = #tpu.pipeline_mode<synchronous>, transform_indices = @transform_1, window_bounds = array<i64: 16, 32>}, {pipeline_mode = #tpu.pipeline_mode<synchronous>, transform_indices = @transform_2, window_bounds = array<i64: 1, 32>}, {pipeline_mode = #tpu.pipeline_mode<synchronous>, transform_indices = @transform_3, window_bounds = array<i64: 32, 64>}, {pipeline_mode = #tpu.pipeline_mode<synchronous>, transform_indices = @transform_4, window_bounds = array<i64: 1, 64>}, {transform_indices = @transform_5, window_bounds = array<i64: 8, 64>}]} {
    %c0 = arith.constant 0 : index
    %c0_0 = arith.constant 0 : index
    %0 = vector.load %arg1[%c0, %c0_0] : memref<8x16xbf16, #tpu.memory_space<vmem>>, vector<8x16xbf16>
    %c0_1 = arith.constant 0 : index
    %c0_2 = arith.constant 0 : index
    %1 = vector.load %arg2[%c0_1, %c0_2] : memref<16x32xbf16, #tpu.memory_space<vmem>>, vector<16x32xbf16>
    %cst = arith.constant dense<0.000000e+00> : vector<8x32xf32>
    %2 = tpu.matmul %0, %1, %cst {dimension_numbers = #tpu.dot_dimension_numbers<[1], [0], [0], [1], [0, 0, 1, 1], [], []>} : vector<8x16xbf16>, vector<16x32xbf16>, vector<8x32xf32> -> vector<8x32xf32>
    %c0_3 = arith.constant 0 : index
    %c0_4 = arith.constant 0 : index
    %3 = vector.load %arg3[%c0_3, %c0_4] : memref<1x32xf32, #tpu.memory_space<vmem>>, vector<1x32xf32>
    %4 = vector.broadcast %3 : vector<1x32xf32> to vector<8x32xf32>
    %5 = arith.addf %2, %4 : vector<8x32xf32>
    %cst_5 = arith.constant 0.000000e+00 : f32
    %6 = vector.broadcast %cst_5 : f32 to vector<8x32xf32>
    %7 = arith.maximumf %5, %6 : vector<8x32xf32>
    %8 = arith.truncf %7 : vector<8x32xf32> to vector<8x32xbf16>
    %c0_6 = arith.constant 0 : index
    %c0_7 = arith.constant 0 : index
    %9 = vector.load %arg4[%c0_6, %c0_7] : memref<32x64xbf16, #tpu.memory_space<vmem>>, vector<32x64xbf16>
    %cst_8 = arith.constant dense<0.000000e+00> : vector<8x64xf32>
    %10 = tpu.matmul %8, %9, %cst_8 {dimension_numbers = #tpu.dot_dimension_numbers<[1], [0], [0], [1], [0, 0, 1, 1], [], []>} : vector<8x32xbf16>, vector<32x64xbf16>, vector<8x64xf32> -> vector<8x64xf32>
    %c0_9 = arith.constant 0 : index
    %c0_10 = arith.constant 0 : index
    %11 = vector.load %arg5[%c0_9, %c0_10] : memref<1x64xf32, #tpu.memory_space<vmem>>, vector<1x64xf32>
    %12 = vector.broadcast %11 : vector<1x64xf32> to vector<8x64xf32>
    %13 = arith.addf %10, %12 : vector<8x64xf32>
    %cst_11 = arith.constant 0.000000e+00 : f32
    %14 = vector.broadcast %cst_11 : f32 to vector<8x64xf32>
    %15 = arith.subf %14, %13 : vector<8x64xf32>
    %16 = math.exp %15 : vector<8x64xf32>
    %cst_12 = arith.constant 1.000000e+00 : f32
    %17 = vector.broadcast %cst_12 : f32 to vector<8x64xf32>
    %18 = arith.addf %17, %16 : vector<8x64xf32>
    %19 = tpu.reciprocal %18 {approx = true} : vector<8x64xf32> -> vector<8x64xf32>
    %20 = arith.truncf %19 : vector<8x64xf32> to vector<8x64xbf16>
    %c0_13 = arith.constant 0 : index
    %c0_14 = arith.constant 0 : index
    %21 = vector.load %arg6[%c0_13, %c0_14] : memref<8x64xbf16, #tpu.memory_space<vmem>>, vector<8x64xbf16>
    tpu.vector_store %arg6[%c0_13, %c0_14], %20 {strides = array<i32>} : memref<8x64xbf16, #tpu.memory_space<vmem>>, vector<8x64xbf16>,
    return
  }
  func.func @transform_0(%arg0: i32) -> (i32, i32) {
    %c0_i32 = arith.constant 0 : i32
    %c0_i32_0 = arith.constant 0 : i32
    return %arg0, %c0_i32 : i32, i32
  }
  func.func @transform_1(%arg0: i32) -> (i32, i32) {
    %c0_i32 = arith.constant 0 : i32
    %c0_i32_0 = arith.constant 0 : i32
    %c0_i32_1 = arith.constant 0 : i32
    return %c0_i32, %c0_i32_0 : i32, i32
  }
  func.func @transform_2(%arg0: i32) -> (i32, i32) {
    %c0_i32 = arith.constant 0 : i32
    %c0_i32_0 = arith.constant 0 : i32
    %c0_i32_1 = arith.constant 0 : i32
    return %c0_i32, %c0_i32_0 : i32, i32
  }
  func.func @transform_3(%arg0: i32) -> (i32, i32) {
    %c0_i32 = arith.constant 0 : i32
    %c0_i32_0 = arith.constant 0 : i32
    %c0_i32_1 = arith.constant 0 : i32
    return %c0_i32, %c0_i32_0 : i32, i32
  }
  func.func @transform_4(%arg0: i32) -> (i32, i32) {
    %c0_i32 = arith.constant 0 : i32
    %c0_i32_0 = arith.constant 0 : i32
    %c0_i32_1 = arith.constant 0 : i32
    return %c0_i32, %c0_i32_0 : i32, i32
  }
  func.func @transform_5(%arg0: i32) -> (i32, i32) {
    %c0_i32 = arith.constant 0 : i32
    %c0_i32_0 = arith.constant 0 : i32
    return %arg0, %c0_i32 : i32, i32
  }
}

</mosaic_0001>

<bundles_post_ra>
// kernel: tpu_custom_call.1
= control target key start
LH: loop header
LB: loop body
LE: loop exit
PB: predicated region body
PF: predicated region fallthrough
CT: control target
= control target key end

     0   :  { %10 = vsyncpa [#allocation3], 0  ;;  %s447_s0 = inlined_call_operand.hbm [shape: bf16[8,16], index: 0, kind: input, shape index: {}]   ;;  %s448_s1 = inlined_call_operand.hbm [shape: bf16[16,32], index: 1, kind: input, shape index: {}]   ;;  %s449_s2 = inlined_call_operand.vmem [shape: f32[1,32], index: 2, kind: input, shape index: {}]   ;;  %s450_s3 = inlined_call_operand.hbm [shape: bf16[32,64], index: 3, kind: input, shape index: {}]   ;;  %s451_s4 = inlined_call_operand.vmem [shape: f32[1,64], index: 4, kind: input, shape index: {}]   ;;  %s452_s5 = inlined_call_operand.hbm [shape: bf16[8,64], index: 5, kind: output, shape index: {}]  }
   0x1   :  { %11 = vsyncpa [#allocation6], 0 }
   0x2   :  { %12 = vsyncpa [#allocation4], 0  ;;  %s349_s18 = smov [#allocation5]   ;;  %s255_s22 = scalar_lea.hbm %s448_s1, 128 }
   0x3   :  { %s28_s19 = sshll.u32 %s349_s18, 4  ;;  %p256_p0 = scmp.ne.s32.totalorder %s448_s1, %s255_s22  ;;  %s29_s19 = int_to_ptr.vmem [resolvable:$true] %s28_s19 }
   0x4   :  { %p259_p1 = scmp.lt.u32.totalorder %s255_s22, %s448_s1 }
   0x6   :  { %p261_p2 = pnand %p259_p1, %p256_p0 }
   0x8   :  { %264 = shalt.err (!%p261_p2)
}
   0x9   :  { %s265_s27 = scalar_lea.vmem %s29_s19, 128  ;;  %p270_p4 = scmp.lt.s32.totalorder %s29_s19, %s29_s19 }
   0xa   :  { %p266_p3 = scmp.ne.s32.totalorder %s29_s19, %s265_s27  ;;  %p271_p5 = scmp.lt.s32.totalorder %s265_s27, %s265_s27 }
   0xc   :  { %p272_p6 = por %p271_p5, %p270_p4 }
   0xe   :  { %p273_p7 = pnand %p272_p6, %p266_p3 }
  0x10   :  { %276 = shalt.err (!%p273_p7)
}
  0x11   :  { %s350_s28 = smov 64   ;;  %s351_s29 = smov 4  }
  0x12   :  { %34 = dma.hbm_to_vmem [thread:$0]  %s448_s1, 128, %s29_s19, [#allocation6], %s350_s28, %s350_s28, %s351_s29  }
  0x13   :  { %s352_s7 = smov [#allocation2]   ;;  %s353_s9 = smov [#allocation7]  }
  0x14   :  { %s19_s8 = sshll.u32 %s352_s7, 4  ;;  %s42_s10 = sshll.u32 %s353_s9, 4  ;;  %s20_s8 = int_to_ptr.vmem [resolvable:$true] %s19_s8  ;;  %s43_s10 = int_to_ptr.vmem [resolvable:$true] %s42_s10 }
  0x15   :  { %s277_s13 = scalar_lea.hbm %s447_s0, 64 }
  0x16   :  { %p278_p8 = scmp.ne.s32.totalorder %s447_s0, %s277_s13  ;;  %p281_p9 = scmp.lt.u32.totalorder %s277_s13, %s447_s0 }
  0x18   :  { %p283_p10 = pnand %p281_p9, %p278_p8 }
  0x1a   :  { %286 = shalt.err (!%p283_p10)
}
  0x1b   :  { %s287_s1 = scalar_lea.vmem %s20_s8, 64  ;;  %p292_p12 = scmp.lt.s32.totalorder %s20_s8, %s20_s8 }
  0x1c   :  { %p288_p11 = scmp.ne.s32.totalorder %s20_s8, %s287_s1  ;;  %p293_p13 = scmp.lt.s32.totalorder %s287_s1, %s287_s1 }
  0x1e   :  { %p294_p0 = por %p293_p13, %p292_p12 }
  0x20   :  { %p295_p1 = pnand %p294_p0, %p288_p11 }
  0x22   :  { %298 = shalt.err (!%p295_p1)
}
  0x23   :  { %22 = dma.hbm_to_vmem [thread:$0]  %s447_s0, 64, %s20_s8, [#allocation3]  }
  0x24   :  { %s299_s22 = scalar_lea.hbm %s450_s3, 256 }
  0x25   :  { %p300_p2 = scmp.ne.s32.totalorder %s450_s3, %s299_s22  ;;  %p303_p3 = scmp.lt.u32.totalorder %s299_s22, %s450_s3 }
  0x27   :  { %p305_p4 = pnand %p303_p3, %p300_p2 }
  0x29   :  { %308 = shalt.err (!%p305_p4)
}
  0x2a   :  { %s309_s27 = scalar_lea.vmem %s43_s10, 256  ;;  %p314_p6 = scmp.lt.s32.totalorder %s43_s10, %s43_s10 }
  0x2b   :  { %p310_p5 = scmp.ne.s32.totalorder %s43_s10, %s309_s27  ;;  %p315_p7 = scmp.lt.s32.totalorder %s309_s27, %s309_s27 }
  0x2d   :  { %p316_p8 = por %p315_p7, %p314_p6 }
  0x2f   :  { %p317_p9 = pnand %p316_p8, %p310_p5 }
  0x31   :  { %320 = shalt.err (!%p317_p9)
}
  0x32   :  { %48 = dma.hbm_to_vmem [thread:$0]  %s450_s3, 256, %s43_s10, [#allocation6], %s350_s28, %s350_s28, %s351_s29  }
  0x33   :  { %343 = dma.done.wait [#allocation3], 64  }
  0x34   :  { %344 = vsyncadd [#allocation3], 4294967232 }
  0x35   :  { %345 = dma.done.wait [#allocation6], 384  }
  0x36   :  { %346 = vsyncadd [#allocation6], 4294966912  ;;  %v354_v0 = vmov 0.0   ;;  %vm355_vm0 = vmmov 0   ;;  %v248_v1 = vld [vmem:[#allocation5] sm:$0xff]   ;;  %vm77_vm1 = vcmask 130048  }
  0x37   :  { %226 = vmatprep.subr.bf16.mxu0 %v354_v0  ;;  %228 = vmatprep.mubr.msk.bf16.mxu0 %vm355_vm0, %v354_v0  ;;  %v61_v2 = vld [vmem:[#allocation2] sm:$0xf]  ;;  %v249_v3 = vld [vmem:[#allocation7] sm:$0xff]   ;;  %v250_v4 = vld [vmem:[#allocation7 + $0x8] sm:$0xff]   ;;  %vm146_vm2 = vcmask 261120   ;;  %vm196_vm3 = vcmask 519168  }
  0x38   :  { %232 = vmatprep.subr.bf16.mxu1 %v354_v0  ;;  %236 = vmatprep.mubr.msk.bf16.mxu1 %vm355_vm0, %v354_v0  ;;  %v214_v5 = vld [vmem:[%s449_s2] ss:$0 sm:$0xff]  ;;  %s356_s2 = smov [#allocation8]  }
  0x39   :  { %227 = vmatpush3.bf16.msra.mxu0 %v248_v1  ;;  %233 = vmatpush3.bf16.msra.mxu1 %v249_v3  ;;  %v217_v13 = vld [vmem:[%s451_s4] ss:$0 sm:$0xff]  ;;  %s204_s7 = sshll.u32 %s356_s2, 4  ;;  %s205_s7 = int_to_ptr.vmem [resolvable:$true] %s204_s7 }
  0x3a   :  { %234 = vmatprep.subr.bf16.mxu1 %v354_v0  ;;  %s321_s8 = scalar_lea.vmem %s205_s7, 64  ;;  %p326_p11 = scmp.lt.s32.totalorder %s205_s7, %s205_s7 }
  0x3b   :  { %p322_p10 = scmp.ne.s32.totalorder %s205_s7, %s321_s8  ;;  %p327_p12 = scmp.lt.s32.totalorder %s321_s8, %s321_s8 }
  0x3c   :  { %229 = vmatmul.mubr.msk.bf16.vlgmr.msra.gmra.mrb[0].mxu0 %vm77_vm1, %v61_v2 }
  0x3d   :  { %235 = vmatpush3.bf16.msra.mxu1 %v250_v4  ;;  %p328_p13 = por %p327_p12, %p326_p11 }
  0x3f   :  { %p329_p0 = pnand %p328_p13, %p322_p10 }
 0x10f   :  { %v115_v6 = vpop.f32.mrb[0].mxu0 }
 0x110   :  { %v116_v7 = vadd.f32 %v214_v5, %v115_v6  ;;  %v230_v8 = vpop.f32.mrb[1].mxu0 }
 0x111   :  { %v118_v9 = vpop.f32.mrb[2].mxu0 }
 0x112   :  { %v121_v10 = vmax.f32 %v116_v7, 0.0  ;;  %v231_v11 = vpop.f32.mrb[3].mxu0 }
 0x114   :  { %v122_v12 = vpack.c.bf16 %v121_v10, %v121_v10 }
 0x116   :  { %237 = vmatmul.mubr.msk.bf16.vlgmr.msra.gmra.mrb[0].mxu1 %vm146_vm2, %v122_v12 }
 0x1e9   :  { %v184_v14 = vpop.f32.mrb[0].mxu1 }
 0x1ea   :  { %v185_v15 = vadd.f32 %v217_v13, %v184_v14  ;;  %v238_v16 = vpop.f32.mrb[1].mxu1 }
 0x1eb   :  { %v187_v17 = vpop.f32.mrb[2].mxu1 }
 0x1ec   :  { %v190_v18 = vsub.f32 0.0, %v185_v15  ;;  %v239_v19 = vpop.f32.mrb[3].mxu1 }
 0x1ee   :  { %v191_v20 = vmul.f32 1.442695, %v190_v18 }
 0x1f0   :  { %251 = vpow2.f32 %v191_v20 }
 0x1fa   :  { %v252_v21 = vpop.eup %251 }
 0x1fb   :  { %v193_v22 = vadd.f32 1.0, %v252_v21 }
 0x1fd   :  { %253 = vrcp.f32 %v193_v22 }
 0x207   :  { %v254_v23 = vpop.eup %253 }
 0x208   :  { %v195_v24 = vpack.c.bf16 %v254_v23, %v254_v23 }
 0x20a   :  { %197 = vst.msk [vmem:[#allocation8] sm:$0xf] %vm196_vm3, %v195_v24 }
 0x20b   :  { %332 = shalt.err (!%p329_p0)
}
 0x20c   :  { %s333_s10 = scalar_lea.hbm %s452_s5, 64 }
 0x20d   :  { %p334_p1 = scmp.ne.s32.totalorder %s452_s5, %s333_s10  ;;  %p337_p2 = scmp.lt.u32.totalorder %s333_s10, %s452_s5 }
 0x20f   :  { %p339_p3 = pnand %p337_p2, %p334_p1 }
 0x211   :  { %342 = shalt.err (!%p339_p3)
}
 0x212   :  { %207 = dma.vmem_to_hbm [thread:$0]  %s205_s7, 64, %s452_s5, [#allocation4]  }
 0x213   :  { %347 = dma.done.wait [#allocation4], 64  }
 0x214   :  { %348 = vsyncadd [#allocation4], 4294967232 }
 0x215   :  { %211 = vsyncpa [#allocation3], 1 }
 0x216   :  { %212 = vsyncpa [#allocation6], 1 }
 0x217   :  { %213 = vsyncpa [#allocation4], 1 }

</bundles_post_ra>
